<compile_context>
chip_gen: v5e
topology: v5e:2x2
jax: 0.10.0
libtpu: 0.0.40
codegen_flags: <defaults>
</compile_context>

<pallas_src>
import math

import jax
import jax.numpy as jnp
from jax.experimental import pallas as pl
from jax.experimental.pallas import tpu as pltpu


def _sinusoidal_kernel(x_ref, table_ref, phase_ref, o_ref):
    # x_ref:     (tb, k)  f32  -- k timesteps folded per 128-lane output row
    # table_ref: (k, W)   f32  -- block-diagonal [freqs|freqs] table, W = k*dim
    # phase_ref: (1, W)   f32  -- [0..0 | pi/2..pi/2] tiled k times
    # o_ref:     (tb, W)       -- [sin | cos] groups, one lane-dense store
    k = table_ref.shape[0]            # static fold factor
    xv = x_ref[...]
    tv = table_ref[...]
    arg = xv[:, 0:1] * tv[0:1, :]
    for r in range(1, k):             # k is small & static; the off-diagonal
        arg = arg + xv[:, r:r + 1] * tv[r:r + 1, :]   # zeros keep this exact
    o_ref[...] = jnp.sin(arg + phase_ref[...]).astype(o_ref.dtype)


def _cdiv(a, b):
    return -(-a // b)


def _round_up(a, m):
    return _cdiv(a, m) * m


def sinusoidal_pos_emb(x, dim, *, out_dtype=jnp.float32, target_block_bytes=4 << 20):
    """Pallas TPU SinusoidalPosEmb forward. x: float timesteps (...,) -> (..., dim)."""
    assert dim % 2 == 0, "dim must be even"
    assert dim >= 4, "dim must be >= 4 (matches the PyTorch module: half_dim - 1 > 0)"
    half_dim = dim // 2

    orig_shape = x.shape
    x_flat = x.astype(jnp.float32).reshape(-1)
    B = x_flat.shape[0]

    # --- grid-invariant tables (computed once, stay VMEM-resident) ----------
    scale = math.log(10000.0) / (half_dim - 1)
    freqs = jnp.exp(jnp.arange(half_dim, dtype=jnp.float32) * (-scale))   # (half,)
    freqs_full = jnp.concatenate([freqs, freqs])                          # (dim,)
    phase_row = jnp.concatenate(
        [jnp.zeros((half_dim,), jnp.float32),
         jnp.full((half_dim,), math.pi / 2, dtype=jnp.float32)])          # (dim,)

    # Lane folding: pack k rows per 128-lane output row when dim < 128.
    k = 128 // dim if (dim < 128 and 128 % dim == 0) else 1
    W = k * dim
    table = jnp.kron(jnp.eye(k, dtype=jnp.float32), freqs_full[None, :])  # (k, W)
    phase = jnp.tile(phase_row, (k,)).reshape(1, W)                       # (1, W)

    # --- tile sizing ---------------------------------------------------------
    out_bytes = jnp.dtype(out_dtype).itemsize
    row_mult = 8 * max(1, 4 // out_bytes)        # sublane multiple: 8 f32 / 16 bf16
    R = _cdiv(B, k)                              # rows of the folded output
    tb_max = max(row_mult,
                 (target_block_bytes // (W * out_bytes)) // row_mult * row_mult)
    min_blocks = 2 if R >= 2 * row_mult else 1   # let both v7x TensorCores work
    num_blocks = max(min_blocks, _cdiv(R, tb_max))
    tb_rows = max(row_mult, _round_up(_cdiv(R, num_blocks), row_mult))
    grid_n = max(1, _cdiv(R, tb_rows))
    R_pad = grid_n * tb_rows
    B_pad = R_pad * k

    # Padding rows compute sin(0 + phase) -- harmless, sliced off below.
    x2d = jnp.pad(x_flat, (0, B_pad - B)).reshape(R_pad, k)

    # Double-buffered out + in blocks + resident tables, with headroom for
    # compiler temporaries; >= 32 MiB (above v5e's 16 MiB default), capped at
    # 48 MiB so it always fits v7x's 64 MiB/TC VMEM.
    vmem_needed = (2 * tb_rows * W * out_bytes
                   + 2 * tb_rows * k * 4
                   + (k + 1) * W * 4)
    vmem_limit = int(min(48 << 20, max(32 << 20, 2 * vmem_needed)))

    out = pl.pallas_call(
        _sinusoidal_kernel,
        out_shape=jax.ShapeDtypeStruct((R_pad, W), out_dtype),
        grid_spec=pltpu.PrefetchScalarGridSpec(
            num_scalar_prefetch=0,
            grid=(grid_n,),
            in_specs=[
                pl.BlockSpec((tb_rows, k), lambda i: (i, 0)),
                pl.BlockSpec((k, W), lambda i: (0, 0)),   # resident freq table
                pl.BlockSpec((1, W), lambda i: (0, 0)),   # resident phase row
            ],
            out_specs=pl.BlockSpec((tb_rows, W), lambda i: (i, 0)),
        ),
        compiler_params=pltpu.CompilerParams(
            dimension_semantics=("parallel",),
            vmem_limit_bytes=vmem_limit,
        ),
    )(x2d, table, phase)

    # Un-fold (row-major contiguous, free), drop padding, restore leading shape.
    return out.reshape(B_pad, dim)[:B].reshape(*orig_shape, dim)


def _reference(x, dim):
    half_dim = dim // 2
    emb = math.log(10000.0) / (half_dim - 1)
    emb = jnp.exp(jnp.arange(half_dim, dtype=jnp.float32) * -emb)
    emb = x.astype(jnp.float32)[..., None] * emb[None, :]
    return jnp.concatenate([jnp.sin(emb), jnp.cos(emb)], axis=-1)


def _check(out, x, dim):
    ref = _reference(x, dim)
    half = dim // 2
    assert out.shape == ref.shape
    # sin half: same f32 argument, same transcendental -> tight tolerance.
    assert jnp.allclose(out[..., :half].astype(jnp.float32), ref[..., :half],
                        atol=1e-5, rtol=1e-5), "sin half mismatch"
    # cos half uses cos(a) = sin(a + pi/2); extra f32 rounding of (a + pi/2)
    # is <= 0.5*ulp(a) (~3e-5 for arguments up to ~1000), hence 1e-4 here.
    assert jnp.allclose(out.astype(jnp.float32), ref,
                        atol=1e-4, rtol=1e-5), "cos half mismatch"


if __name__ == "__main__":
    key = jax.random.PRNGKey(0)

    # Small-dim (lane-folded, dim < 128) path.
    B, dim = 8, 32
    x = jax.random.uniform(key, (B,), dtype=jnp.float32, minval=0.0, maxval=1000.0)
    out = jax.block_until_ready(sinusoidal_pos_emb(x, dim))
    _check(out, x, dim)

    # Tail batch (not a multiple of the tile / fold factor).
    x2 = jax.random.uniform(jax.random.PRNGKey(1), (13,), dtype=jnp.float32,
                            minval=0.0, maxval=1000.0)
    out2 = jax.block_until_ready(sinusoidal_pos_emb(x2, dim))
    _check(out2, x2, dim)

    # Unfolded path (dim >= 128) with >= 2 grid blocks.
    x3 = jax.random.uniform(jax.random.PRNGKey(2), (40,), dtype=jnp.float32,
                            minval=0.0, maxval=1000.0)
    out3 = jax.block_until_ready(sinusoidal_pos_emb(x3, 256))
    _check(out3, x3, 256)

    # bf16 output option (halves HBM write traffic on the write-bound path).
    out_bf16 = jax.block_until_ready(
        sinusoidal_pos_emb(x, dim, out_dtype=jnp.bfloat16))
    assert out_bf16.dtype == jnp.bfloat16
    assert jnp.allclose(out_bf16.astype(jnp.float32), _reference(x, dim),
                        atol=1.5e-2, rtol=1.5e-2), "bf16 output mismatch"

    print("KERNEL_OK")
</pallas_src>

<mosaic_0001>
module attributes {stable_mosaic.version = 11 : i64} {
  func.func @_sinusoidal_kernel(%arg0: i32, %arg1: memref<8x4xf32, #tpu.memory_space<vmem>>, %arg2: memref<4x128xf32, #tpu.memory_space<vmem>>, %arg3: memref<1x128xf32, #tpu.memory_space<vmem>>, %arg4: memref<8x128xf32, #tpu.memory_space<vmem>>) attributes {dimension_semantics = [#tpu.dimension_semantics<parallel>], iteration_bounds = array<i64: 1>, scalar_prefetch = 0 : i64, scratch_operands = 0 : i64, tpu.core_type = #tpu.core_type<tc>, window_params = [{transform_indices = @transform_0, window_bounds = array<i64: 8, 4>}, {pipeline_mode = #tpu.pipeline_mode<synchronous>, transform_indices = @transform_1, window_bounds = array<i64: 4, 128>}, {pipeline_mode = #tpu.pipeline_mode<synchronous>, transform_indices = @transform_2, window_bounds = array<i64: 1, 128>}, {transform_indices = @transform_3, window_bounds = array<i64: 8, 128>}]} {
    %c0 = arith.constant 0 : index
    %c0_0 = arith.constant 0 : index
    %0 = vector.load %arg1[%c0, %c0_0] : memref<8x4xf32, #tpu.memory_space<vmem>>, vector<8x4xf32>
    %c0_1 = arith.constant 0 : index
    %c0_2 = arith.constant 0 : index
    %1 = vector.load %arg2[%c0_1, %c0_2] : memref<4x128xf32, #tpu.memory_space<vmem>>, vector<4x128xf32>
    %2 = vector.extract_strided_slice %0 {offsets = [0, 0], sizes = [8, 1], strides = [1, 1]} : vector<8x4xf32> to vector<8x1xf32>
    %3 = vector.extract_strided_slice %1 {offsets = [0, 0], sizes = [1, 128], strides = [1, 1]} : vector<4x128xf32> to vector<1x128xf32>
    %4 = vector.broadcast %2 : vector<8x1xf32> to vector<8x128xf32>
    %5 = vector.broadcast %3 : vector<1x128xf32> to vector<8x128xf32>
    %6 = arith.mulf %4, %5 : vector<8x128xf32>
    %7 = vector.extract_strided_slice %0 {offsets = [0, 1], sizes = [8, 1], strides = [1, 1]} : vector<8x4xf32> to vector<8x1xf32>
    %8 = vector.extract_strided_slice %1 {offsets = [1, 0], sizes = [1, 128], strides = [1, 1]} : vector<4x128xf32> to vector<1x128xf32>
    %9 = vector.broadcast %7 : vector<8x1xf32> to vector<8x128xf32>
    %10 = vector.broadcast %8 : vector<1x128xf32> to vector<8x128xf32>
    %11 = arith.mulf %9, %10 : vector<8x128xf32>
    %12 = arith.addf %6, %11 : vector<8x128xf32>
    %13 = vector.extract_strided_slice %0 {offsets = [0, 2], sizes = [8, 1], strides = [1, 1]} : vector<8x4xf32> to vector<8x1xf32>
    %14 = vector.extract_strided_slice %1 {offsets = [2, 0], sizes = [1, 128], strides = [1, 1]} : vector<4x128xf32> to vector<1x128xf32>
    %15 = vector.broadcast %13 : vector<8x1xf32> to vector<8x128xf32>
    %16 = vector.broadcast %14 : vector<1x128xf32> to vector<8x128xf32>
    %17 = arith.mulf %15, %16 : vector<8x128xf32>
    %18 = arith.addf %12, %17 : vector<8x128xf32>
    %19 = vector.extract_strided_slice %0 {offsets = [0, 3], sizes = [8, 1], strides = [1, 1]} : vector<8x4xf32> to vector<8x1xf32>
    %20 = vector.extract_strided_slice %1 {offsets = [3, 0], sizes = [1, 128], strides = [1, 1]} : vector<4x128xf32> to vector<1x128xf32>
    %21 = vector.broadcast %19 : vector<8x1xf32> to vector<8x128xf32>
    %22 = vector.broadcast %20 : vector<1x128xf32> to vector<8x128xf32>
    %23 = arith.mulf %21, %22 : vector<8x128xf32>
    %24 = arith.addf %18, %23 : vector<8x128xf32>
    %c0_3 = arith.constant 0 : index
    %c0_4 = arith.constant 0 : index
    %25 = vector.load %arg3[%c0_3, %c0_4] : memref<1x128xf32, #tpu.memory_space<vmem>>, vector<1x128xf32>
    %26 = vector.broadcast %25 : vector<1x128xf32> to vector<8x128xf32>
    %27 = arith.addf %24, %26 : vector<8x128xf32>
    %28 = math.sin %27 : vector<8x128xf32>
    %c0_5 = arith.constant 0 : index
    %c0_6 = arith.constant 0 : index
    %29 = vector.load %arg4[%c0_5, %c0_6] : memref<8x128xf32, #tpu.memory_space<vmem>>, vector<8x128xf32>
    tpu.vector_store %arg4[%c0_5, %c0_6], %28 {strides = array<i32>} : memref<8x128xf32, #tpu.memory_space<vmem>>, vector<8x128xf32>,
    return
  }
  func.func @transform_0(%arg0: i32) -> (i32, i32) {
    %c0_i32 = arith.constant 0 : i32
    %c0_i32_0 = arith.constant 0 : i32
    return %arg0, %c0_i32 : i32, i32
  }
  func.func @transform_1(%arg0: i32) -> (i32, i32) {
    %c0_i32 = arith.constant 0 : i32
    %c0_i32_0 = arith.constant 0 : i32
    %c0_i32_1 = arith.constant 0 : i32
    return %c0_i32, %c0_i32_0 : i32, i32
  }
  func.func @transform_2(%arg0: i32) -> (i32, i32) {
    %c0_i32 = arith.constant 0 : i32
    %c0_i32_0 = arith.constant 0 : i32
    %c0_i32_1 = arith.constant 0 : i32
    return %c0_i32, %c0_i32_0 : i32, i32
  }
  func.func @transform_3(%arg0: i32) -> (i32, i32) {
    %c0_i32 = arith.constant 0 : i32
    %c0_i32_0 = arith.constant 0 : i32
    return %arg0, %c0_i32 : i32, i32
  }
}

</mosaic_0001>

<bundles_post_ra>
// kernel: tpu_custom_call.1
= control target key start
LH: loop header
LB: loop body
LE: loop exit
PB: predicated region body
PF: predicated region fallthrough
CT: control target
= control target key end

     0   :  { %v268_v1 = vmov 0   ;;  %v269_v2 = vmov 2   ;;  %s370_s0 = inlined_call_operand.vmem [shape: f32[8,4], index: 0, kind: input, shape index: {}]   ;;  %s371_s1 = inlined_call_operand.vmem [shape: f32[4,128], index: 1, kind: input, shape index: {}]   ;;  %s372_s2 = inlined_call_operand.vmem [shape: f32[1,128], index: 2, kind: input, shape index: {}]   ;;  %s373_s3 = inlined_call_operand.hbm [shape: f32[8,128], index: 3, kind: output, shape index: {}]  }
   0x1   :  { %v15_v0 = vld [vmem:[%s370_s0] sm:$0xff]  ;;  %236 = vset.pattern.permute.xlu0 %v268_v1  ;;  %238 = vset.pattern.permute.xlu1 %v269_v2 }
   0x2   :  { %8 = vsyncpa [#allocation3], 0  ;;  %19 = vperm.xlu0 %236, %v15_v0   ;;  %32 = vperm.xlu1 %238, %v15_v0   ;;  %v270_v3 = vmov 1   ;;  %v271_v4 = vmov 3   ;;  %v16_v7 = vld [vmem:[%s371_s1] sm:$0xf] }
   0x3   :  { %v22_v8 = vperm.slane %v16_v7, 0  ;;  %v28_v9 = vperm.slane %v16_v7, 1  ;;  %v35_v10 = vperm.slane %v16_v7, 2  ;;  %v42_v11 = vperm.slane %v16_v7, 3  ;;  %v241_v19 = vld [vmem:[%s372_s2] ss:$0 sm:$0xff] }
   0x4   :  { %v272_v34 = vmov 2102212464   ;;  %v273_v36 = vmov 920167782   ;;  %v274_v39 = vmov 1326507024  }
   0x5   :  { %v275_v41 = vmov 683565275   ;;  %v276_v43 = vmov 2475754826   ;;  %v277_v46 = vmov 2131351028  }
   0x6   :  { %s278_s1 = smov [#allocation2]   ;;  %s213_s19 = sshll.u32 %s373_s3, 4  ;;  %s214_s19 = int_to_ptr.hbm [resolvable:$true] %s213_s19 }
   0x7   :  { %s211_s2 = sshll.u32 %s278_s1, 4  ;;  %s212_s2 = int_to_ptr.vmem [resolvable:$true] %s211_s2 }
   0xa   :  { %237 = vset.pattern.permute.xlu0 %v270_v3  ;;  %239 = vset.pattern.permute.xlu1 %v271_v4 }
   0xb   :  { %25 = vperm.xlu0 %237, %v15_v0   ;;  %39 = vperm.xlu1 %239, %v15_v0  }
  0x13   :  { %240 = vset.pattern.permute.xlu0 %v271_v4 }
  0x74   :  { %v20_v5 = vpop.permute.xlu0 %19  ;;  %v33_v6 = vpop.permute.xlu1 %32 }
  0x75   :  { %v23_v14 = vmul.f32 %v22_v8, %v20_v5  ;;  %v36_v16 = vmul.f32 %v35_v10, %v33_v6 }
  0x7d   :  { %v26_v12 = vpop.permute.xlu0 %25  ;;  %v40_v13 = vpop.permute.xlu1 %39 }
  0x7e   :  { %v29_v15 = vmul.f32 %v28_v9, %v26_v12  ;;  %v43_v18 = vmul.f32 %v42_v11, %v40_v13 }
  0x80   :  { %v30_v17 = vadd.f32 %v29_v15, %v23_v14 }
  0x82   :  { %v37_v20 = vadd.f32 %v36_v16, %v30_v17 }
  0x84   :  { %v44_v21 = vadd.f32 %v43_v18, %v37_v20 }
  0x86   :  { %v309_v22 = vadd.f32 %v241_v19, %v44_v21 }
  0x88   :  { %v53_v23 = vand.u32 2139095040, %v309_v22  ;;  %v50_v26 = vand.u32 2147483647, %v309_v22  ;;  %vm52_vm12 = vcmp.lt.s32.totalorder %v309_v22, 0 }
  0x8a   :  { %v54_v24 = vshrl.u32 %v53_v23, 23  ;;  %v57_v28 = vand.u32 8388607, %v50_v26  ;;  %vm51_vm13 = vcmp.le.f32.partialorder %v50_v26, 0.7853982 }
  0x8c   :  { %v222_v25 = vadd.s32 4294967169, %v54_v24  ;;  %v58_v32 = vor.u32 8388608, %v57_v28 }
  0x8e   :  { %v60_v27 = vadd.s32 1, %v222_v25  ;;  %v324_v53 = vshll.u32 %v58_v32, 8 }
  0x90   :  { %vm61_vm0 = vcmp.gt.s32.totalorder %v60_v27, 0  ;;  %v99_v63 = vand.u32 65535, %v324_v53  ;;  %v100_v2 = vshrl.u32 %v324_v53, 16 }
  0x91   :  { %v62_v29 = vsel %vm61_vm0, %v60_v27, 0 }
  0x92   :  { %v64_v30 = vand.u32 31, %v62_v29  ;;  %v317_v33 = vshrl.u32 %v62_v29, 5 }
  0x94   :  { %v315_v31 = vsub.s32 32, %v64_v30  ;;  %v76_v35 = vshll.u32 %v272_v34, %v64_v30  ;;  %v79_v37 = vshll.u32 %v273_v36, %v64_v30  ;;  %v67_v42 = vshll.u32 %v275_v41, %v64_v30 }
  0x95   :  { %v70_v45 = vshll.u32 %v276_v43, %v64_v30  ;;  %v73_v48 = vshll.u32 %v277_v46, %v64_v30  ;;  %vm85_vm1 = vcmp.lt.s32.totalorder %v317_v33, 4  ;;  %vm82_vm2 = vcmp.lt.s32.totalorder %v317_v33, 1 }
  0x96   :  { %v77_v38 = vshrl.u32 %v273_v36, %v315_v31  ;;  %v80_v40 = vshrl.u32 %v274_v39, %v315_v31  ;;  %v68_v44 = vshrl.u32 %v276_v43, %v315_v31  ;;  %v71_v47 = vshrl.u32 %v277_v46, %v315_v31 }
  0x97   :  { %v74_v49 = vshrl.u32 %v272_v34, %v315_v31  ;;  %vm84_vm3 = vcmp.lt.s32.totalorder %v317_v33, 3  ;;  %vm83_vm4 = vcmp.lt.s32.totalorder %v317_v33, 2  ;;  %v66_v27 = vshrl.u32 %v275_v41, %v315_v31 }
  0x98   :  { %v78_v50 = vor.u32 %v77_v38, %v76_v35  ;;  %v81_v51 = vor.u32 %v80_v40, %v79_v37  ;;  %v69_v52 = vor.u32 %v68_v44, %v67_v42  ;;  %v72_v54 = vor.u32 %v71_v47, %v70_v45 }
  0x99   :  { %v75_v55 = vor.u32 %v74_v49, %v73_v48 }
  0x9a   :  { %v91_v56 = vsel %vm85_vm1, %v78_v50, 920167782  ;;  %v95_v57 = vsel %vm85_vm1, %v81_v51, 1326507024  ;;  %v90_v58 = vsel %vm82_vm2, %v69_v52, %v72_v54  ;;  %v86_v35 = vsel %vm82_vm2, %v66_v27, %v69_v52 }
  0x9b   :  { %v92_v59 = vsel %vm84_vm3, %v75_v55, %v91_v56  ;;  %v94_v60 = vsel %vm82_vm2, %v72_v54, %v75_v55  ;;  %v96_v62 = vsel %vm84_vm3, %v78_v50, %v95_v57  ;;  %v87_v23 = vsel %vm85_vm1, %v75_v55, 2102212464 }
  0x9c   :  { %v93_v61 = vsel %vm83_vm4, %v90_v58, %v92_v59  ;;  %v97_v0 = vsel %vm83_vm4, %v94_v60, %v96_v62  ;;  %v88_v36 = vsel %vm84_vm3, %v72_v54, %v87_v23  ;;  %vm193_vm1 = vweird.f32 %v309_v22 }
  0x9d   :  { %v123_v3 = vand.u32 65535, %v93_v61  ;;  %v124_v4 = vshrl.u32 %v93_v61, 16  ;;  %v101_v5 = vand.u32 65535, %v97_v0  ;;  %v102_v6 = vshrl.u32 %v97_v0, 16 }
  0x9e   :  { %v89_v41 = vsel %vm83_vm4, %v86_v35, %v88_v36 }
  0x9f   :  { %v126_v7 = vmul.u32 %v124_v4, %v99_v63  ;;  %v127_v8 = vmul.u32 %v123_v3, %v100_v2  ;;  %v104_v9 = vmul.u32 %v102_v6, %v99_v63  ;;  %v105_v10 = vmul.u32 %v101_v5, %v100_v2 }
  0xa0   :  { %v125_v11 = vmul.u32 %v123_v3, %v99_v63  ;;  %v103_v13 = vmul.u32 %v101_v5, %v99_v63  ;;  %v128_v15 = vmul.u32 %v124_v4, %v100_v2  ;;  %v106_v16 = vmul.u32 %v102_v6, %v100_v2 }
  0xa1   :  { %v129_v12 = vshll.u32 %v126_v7, 16  ;;  %v107_v14 = vshll.u32 %v104_v9, 16  ;;  %v131_v17 = vshll.u32 %v127_v8, 16  ;;  %v109_v19 = vshll.u32 %v105_v10, 16 }
  0xa2   :  { %v130_v32 = vshrl.u32 %v126_v7, 16  ;;  %v108_v37 = vshrl.u32 %v104_v9, 16  ;;  %v132_v39 = vshrl.u32 %v127_v8, 16  ;;  %v110_v42 = vshrl.u32 %v105_v10, 16 }
  0xa3   :  { %vm133_vm5 = vc.u32 %v125_v11, %v129_v12  ;;  %v135_v18 = vadd.s32 %v129_v12, %v125_v11  ;;  %vm111_vm6 = vc.u32 %v103_v13, %v107_v14  ;;  %v113_v20 = vadd.s32 %v107_v14, %v103_v13 }
  0xa4   :  { %v134_v21 = vsel %vm133_vm5, 1, %v268_v1  ;;  %v112_v24 = vsel %vm111_vm6, 1, %v268_v1  ;;  %v143_v46 = vmul.u32 %v324_v53, %v89_v41 }
  0xa5   :  { %v136_v25 = vadd.s32 %v134_v21, %v128_v15  ;;  %vm137_vm7 = vc.u32 %v135_v18, %v131_v17  ;;  %v114_v28 = vadd.s32 %v112_v24, %v106_v16  ;;  %vm115_vm8 = vc.u32 %v113_v20, %v109_v19 }
  0xa6   :  { %v138_v29 = vsel %vm137_vm7, 1, %v268_v1  ;;  %v116_v30 = vsel %vm115_vm8, 1, %v268_v1  ;;  %v139_v1 = vadd.s32 %v135_v18, %v131_v17 }
  0xa7   :  { %v140_v34 = vadd.s32 %v138_v29, %v136_v25  ;;  %v118_v38 = vadd.s32 %v116_v30, %v114_v28 }
  0xa9   :  { %v141_v40 = vadd.s32 %v140_v34, %v130_v32  ;;  %v119_v31 = vadd.s32 %v118_v38, %v108_v37 }
  0xab   :  { %v142_v43 = vadd.s32 %v141_v40, %v132_v39  ;;  %v120_v44 = vadd.s32 %v119_v31, %v110_v42 }
  0xad   :  { %v146_v45 = vadd.s32 1, %v142_v43  ;;  %vm145_vm9 = vc.u32 %v120_v44, %v139_v1  ;;  %v144_v58 = vadd.s32 %v139_v1, %v120_v44 }
  0xaf   :  { %v147_v47 = vsel %vm145_vm9, %v146_v45, %v142_v43 }
  0xb0   :  { %v148_v48 = vadd.s32 %v147_v47, %v143_v46 }
  0xb2   :  { %v149_v49 = vadd.s32 536870912, %v148_v48 }
  0xb4   :  { %v150_v50 = vshrl.u32 %v149_v49, 30 }
  0xb6   :  { %v151_v51 = vshll.u32 %v150_v50, 30  ;;  %v174_v8 = vsub.s32 4, %v150_v50 }
  0xb8   :  { %v152_v52 = vsub.s32 %v148_v48, %v151_v51  ;;  %v175_v13 = vsel %vm52_vm12, %v174_v8, %v150_v50 }
  0xb9   :  { %v177_v16 = vsel %vm51_vm13, 0, %v175_v13 }
  0xba   :  { %vm153_vm10 = vcmp.lt.s32.totalorder %v152_v52, 0  ;;  %v154_v54 = vsub.s32 0, %v152_v52  ;;  %v194_v21 = vadd.s32 3, %v177_v16 }
  0xbc   :  { %v155_v55 = vsel %vm153_vm10, %v154_v54, %v152_v52  ;;  %v195_v27 = vand.u32 3, %v194_v21 }
  0xbd   :  { %v156_v56 = vclz %v155_v55 }
  0xbe   :  { %vm197_vm14 = vcmp.eq.s32.totalorder %v195_v27, 0  ;;  %vm200_vm15 = vcmp.eq.s32.totalorder %v195_v27, 2  ;;  %vm196_vm0 = vcmp.lt.s32.totalorder %v195_v27, 2 }
  0xbf   :  { %v223_v57 = vadd.s32 4294967294, %v156_v56 }
  0xc1   :  { %vm224_vm11 = vcmp.lt.s32.totalorder %v223_v57, 0 }
  0xc2   :  { %v159_v33 = vsel %vm224_vm11, 0, %v223_v57 }
  0xc3   :  { %v160_v59 = vsub.s32 32, %v159_v33  ;;  %v164_v60 = vsub.s32 4294967266, %v159_v33  ;;  %v161_v61 = vshll.u32 %v152_v52, %v159_v33 }
  0xc5   :  { %v162_v62 = vshrl.u32 %v144_v58, %v160_v59  ;;  %v165_v53 = vadd.s32 127, %v164_v60 }
  0xc7   :  { %v163_v63 = vor.u32 %v162_v62, %v161_v61  ;;  %v166_v0 = vshll.u32 %v165_v53, 23 }
  0xc9   :  { %v167_v2 = vor.u32 4788187, %v166_v0  ;;  %v170_v4 = vcvt.s32.f32 %v163_v63 }
  0xcb   :  { %v168_v3 = vand.u32 2147483647, %v167_v2 }
  0xcd   :  { %v171_v5 = vmul.f32 %v170_v4, %v168_v3 }
  0xcf   :  { %v172_v6 = vxor.u32 2147483648, %v171_v5 }
  0xd1   :  { %v173_v7 = vsel %vm52_vm12, %v172_v6, %v171_v5 }
  0xd2   :  { %v176_v9 = vsel %vm51_vm13, %v309_v22, %v173_v7 }
  0xd3   :  { %v178_v10 = vmul.f32 %v176_v9, %v176_v9 }
  0xd5   :  { %v179_v11 = vmul.f32 -0.001358992, %v178_v10  ;;  %v186_v12 = vmul.f32 -0.00019511016, %v178_v10 }
  0xd7   :  { %v180_v14 = vadd.f32 0.041655596, %v179_v11  ;;  %v187_v15 = vadd.f32 0.008332121, %v186_v12 }
  0xd9   :  { %v181_v17 = vmul.f32 %v180_v14, %v178_v10  ;;  %v188_v18 = vmul.f32 %v187_v15, %v178_v10 }
  0xdb   :  { %v182_v19 = vadd.f32 -0.4999988, %v181_v17  ;;  %v189_v20 = vadd.f32 -0.16666654, %v188_v18 }
  0xdd   :  { %v183_v23 = vmul.f32 %v182_v19, %v178_v10  ;;  %v190_v24 = vmul.f32 %v189_v20, %v178_v10 }
  0xdf   :  { %v184_v25 = vadd.f32 1.0, %v183_v23  ;;  %v191_v26 = vadd.f32 1.0, %v190_v24 }
  0xe1   :  { %v192_v28 = vmul.f32 %v191_v26, %v176_v9  ;;  %v201_v29 = vxor.u32 2147483648, %v184_v25 }
  0xe3   :  { %v198_v30 = vxor.u32 2147483648, %v192_v28  ;;  %v202_v34 = vsel %vm200_vm15, %v201_v29, %v192_v28 }
  0xe5   :  { %v199_v32 = vsel %vm197_vm14, %v184_v25, %v198_v30 }
  0xe6   :  { %v203_v35 = vsel %vm196_vm0, %v199_v32, %v202_v34 }
  0xe7   :  { %v204_v36 = vsel %vm193_vm1, nan, %v203_v35 }
  0xe8   :  { %205 = vst [vmem:[#allocation2] sm:$0xff] %v204_v36 }
  0xe9   :  { %216 = dma.vmem_to_hbm [thread:$0]  %s212_s2, 128, %s214_s19, [#allocation3]  }
  0xea   :  { %266 = dma.done.wait [#allocation3], 128  }
  0xeb   :  { %267 = vsyncadd [#allocation3], 4294967168 }
  0xec   :  { %221 = vsyncpa [#allocation3], 1 }

</bundles_post_ra>
